<compile_context>
chip_gen: v6e
topology: v6e:2x2x1
jax: 0.10.0
libtpu: 0.0.40
codegen_flags: <defaults>
</compile_context>

<pallas_src>
import functools

import jax
import jax.numpy as jnp
from jax import lax
from jax.experimental import pallas as pl
from jax.experimental.pallas import tpu as pltpu


def _round_up(x, m):
    return -(-x // m) * m


# --------------------------------------------------------------------------
# Stage 1: encode GEMV, streaming w_enc_T over the CHW axis
# --------------------------------------------------------------------------
def _encode_stream_kernel(conv_ref, w_ref, part_ref, acc_ref, *,
                          k_tile, steps_per_split):
    p = pl.program_id(0)          # core-split index ("parallel")
    k = pl.program_id(1)          # CHW reduction step ("arbitrary")

    @pl.when(k == 0)
    def _init():
        acc_ref[...] = jnp.zeros_like(acc_ref)

    # conv_flat is resident; slice this step's window in-VMEM (no per-step DMA).
    start = pl.multiple_of((p * steps_per_split + k) * k_tile, k_tile)
    x = conv_ref[:, pl.ds(start, k_tile)]                 # [1, k_tile] bf16

    # [1, k_tile] @ [k_tile, hidden_pad]  ->  f32 accumulate (natural MXU rhs,
    # contiguous slab, no transpose in the lowering).
    acc_ref[...] += lax.dot_general(
        x, w_ref[...],
        dimension_numbers=(((1,), (0,)), ((), ())),
        preferred_element_type=jnp.float32)

    @pl.when(k == steps_per_split - 1)
    def _flush():
        # Lane-dense, unmasked store: replicate the [1, hidden] partial across
        # the 8 sublanes of this split's output tile.
        part_ref[...] = jnp.broadcast_to(acc_ref[...][:, None, :], part_ref.shape)


# --------------------------------------------------------------------------
# Stage 2: tiny epilogue -- combine partials, decode, softmax, attention mats
# --------------------------------------------------------------------------
def _attention_epilogue_kernel(part_ref, emb_label_ref, w_dec_ref, b_dec_ref,
                               conv_mat_ref, att_ref, attended_ref,
                               densified_ref, *, do_softmax, hw_valid, hw_pad):
    # Combine the per-split encode partials (row 0 of each 8-sublane tile).
    emb_feat = jnp.sum(part_ref[...][:, 0:1, :], axis=0)          # [1, hidden_pad]
    modulated = emb_label_ref[...] * emb_feat                     # [L_pad, hidden_pad]

    # decode: modulated @ w_dec.T + bias   (w_dec kept in stored [HW, hidden], f32)
    att = lax.dot_general(
        modulated, w_dec_ref[...],
        dimension_numbers=(((1,), (1,)), ((), ())),
        preferred_element_type=jnp.float32) + b_dec_ref[...]

    if do_softmax:
        if hw_pad != hw_valid:
            col = lax.broadcasted_iota(jnp.int32, att.shape, 1)
            att = jnp.where(col < hw_valid, att, -1e30)           # mask padded cols
        m = jnp.max(att, axis=-1, keepdims=True)
        e = jnp.exp(att - m)
        s = jnp.sum(e, axis=-1, keepdims=True)
        att = e / s                                               # exact divide (runs once)

    att_ref[...] = att

    conv_mat = conv_mat_ref[...]                                  # [C_pad, HW_pad] f32

    # attended_feat = attention @ conv_mat.T   -> [L_pad, C_pad]
    attended = lax.dot_general(
        att, conv_mat,
        dimension_numbers=(((1,), (1,)), ((), ())),
        preferred_element_type=jnp.float32)
    attended_ref[...] = attended

    # densified_attention = attended_feat @ conv_mat -> [L_pad, HW_pad]
    densified_ref[...] = jnp.dot(attended, conv_mat,
                                 preferred_element_type=jnp.float32)


# --------------------------------------------------------------------------
# One-time parameter prep (cache this; do NOT redo it every forward)
# --------------------------------------------------------------------------
def prepare_attention_global_params(label_weights, w_enc, w_dec, b_dec,
                                    conv_shape, *, num_splits=2, k_tile=None):
    """Cast/pad/transpose the weights once, into the kernel-native layout.

    conv_shape  : (C, H, W) of the conv feature the layer will see
    num_splits  : leading "parallel" grid axis (2 = v7x dual-TC split; harmless
                  and near-free on single-TC v5e/v6e)
    """
    C, H, W = conv_shape
    HW = H * W
    CHW = C * HW
    hidden = w_enc.shape[0]
    assert w_enc.shape == (hidden, CHW)
    assert w_dec.shape == (HW, hidden)
    assert b_dec.shape == (HW,)

    hidden_pad = _round_up(hidden, 128)
    HW_pad = _round_up(HW, 128)
    C_pad = _round_up(C, 128)

    # ~6 MiB of bf16 w_enc_T per grid step (double-buffered ~12 MiB): keeps the
    # ~0.35us per-step pipeline overhead <10% even at v7x HBM rates and fits
    # every generation's VMEM with room to spare.
    if k_tile is None:
        k_tile = max(256, ((6 << 20) // (hidden_pad * 2)) // 256 * 256)
    k_tile = _round_up(k_tile, 256)
    k_tile = min(k_tile, _round_up(CHW, 256))
    CHW_pad = _round_up(CHW, k_tile * num_splits)

    bf16, f32 = jnp.bfloat16, jnp.float32

    # Transposed, contiguous, bf16 encode weight: [CHW_pad, hidden_pad].
    w_enc_t = jnp.pad(w_enc.T.astype(bf16),
                      ((0, CHW_pad - CHW), (0, hidden_pad - hidden)))
    # Epilogue operands stay f32 (accuracy is free there).
    w_dec_p = jnp.pad(w_dec.astype(f32),
                      ((0, HW_pad - HW), (0, hidden_pad - hidden)))
    b_p = jnp.pad(b_dec.astype(f32).reshape(1, HW), ((0, 0), (0, HW_pad - HW)))
    lw_p = jnp.pad(label_weights.astype(f32), ((0, 0), (0, hidden_pad - hidden)))

    return dict(
        w_enc_t=w_enc_t, w_dec=w_dec_p, b_dec=b_p, label_weights=lw_p,
        C=C, H=H, W=W, HW=HW, CHW=CHW, hidden=hidden,
        C_pad=C_pad, HW_pad=HW_pad, hidden_pad=hidden_pad, CHW_pad=CHW_pad,
        k_tile=k_tile, num_splits=num_splits)


# --------------------------------------------------------------------------
# Forward pass
# --------------------------------------------------------------------------
def attention_layer_global(params, conv_feat, pos_cls, do_softmax=True):
    """JAX/Pallas equivalent of AttentionLayerGlobal.forward.

    params    : output of prepare_attention_global_params (cached weights)
    conv_feat : [1, C, H, W] float32 (batch must be 1, as in the module)
    pos_cls   : [L] int32 class indices
    Returns (attention [L,H,W], attended_feat [L,C], densified_attention [L,H,W]).
    """
    C, H, W = params["C"], params["H"], params["W"]
    HW, CHW = params["HW"], params["CHW"]
    assert conv_feat.shape == (1, C, H, W), conv_feat.shape

    hidden_pad = params["hidden_pad"]
    HW_pad = params["HW_pad"]
    C_pad = params["C_pad"]
    CHW_pad = params["CHW_pad"]
    k_tile = params["k_tile"]
    P = params["num_splits"]
    steps_per_split = CHW_pad // (k_tile * P)

    L = pos_cls.shape[0]
    L_pad = _round_up(L, 8)

    f32, bf16 = jnp.float32, jnp.bfloat16

    # Per-call activation prep (small tensors only).
    conv_flat = conv_feat.reshape(1, CHW).astype(bf16)
    if CHW_pad != CHW:
        conv_flat = jnp.pad(conv_flat, ((0, 0), (0, CHW_pad - CHW)))
    conv_mat = conv_feat.reshape(C, HW).astype(f32)          # epilogue stays f32
    if (C_pad, HW_pad) != (C, HW):
        conv_mat = jnp.pad(conv_mat, ((0, C_pad - C), (0, HW_pad - HW)))

    emb_label = params["label_weights"][pos_cls]             # tiny gather in the glue
    if L_pad != L:
        emb_label = jnp.pad(emb_label, ((0, L_pad - L), (0, 0)))

    # ---- Stage 1: stream w_enc_T, CHW reduction split across cores --------
    enc_kernel = functools.partial(_encode_stream_kernel,
                                   k_tile=k_tile,
                                   steps_per_split=steps_per_split)
    partials = pl.pallas_call(
        enc_kernel,
        out_shape=jax.ShapeDtypeStruct((P, 8, hidden_pad), f32),
        grid_spec=pltpu.PrefetchScalarGridSpec(
            num_scalar_prefetch=0,
            grid=(P, steps_per_split),
            in_specs=[
                # conv_flat: resident, fetched once (constant index_map)
                pl.BlockSpec((1, CHW_pad), lambda p, k: (0, 0)),
                # w_enc_T: contiguous (k_tile, hidden_pad) slab per step
                pl.BlockSpec((k_tile, hidden_pad),
                             lambda p, k: (p * steps_per_split + k, 0)),
            ],
            out_specs=pl.BlockSpec((1, 8, hidden_pad), lambda p, k: (p, 0, 0)),
            scratch_shapes=[pltpu.VMEM((1, hidden_pad), f32)],
        ),
        compiler_params=pltpu.CompilerParams(
            dimension_semantics=("parallel", "arbitrary"),
            # double-buffered ~12 MiB stream + small residents; 48 MiB leaves
            # headroom under v7x's 64 MiB physical VMEM and is trivial on v5e/v6e.
            vmem_limit_bytes=48 * 1024 * 1024),
    )(conv_flat, params["w_enc_t"])

    # ---- Stage 2: tiny epilogue (runs once) --------------------------------
    epi_kernel = functools.partial(_attention_epilogue_kernel,
                                   do_softmax=do_softmax,
                                   hw_valid=HW, hw_pad=HW_pad)
    out_shapes = (jax.ShapeDtypeStruct((L_pad, HW_pad), f32),
                  jax.ShapeDtypeStruct((L_pad, C_pad), f32),
                  jax.ShapeDtypeStruct((L_pad, HW_pad), f32))

    att, attended, densified = pl.pallas_call(
        epi_kernel,
        out_shape=out_shapes,
        grid_spec=pltpu.PrefetchScalarGridSpec(
            num_scalar_prefetch=0,
            grid=(1,),
            in_specs=[
                pl.BlockSpec((P, 8, hidden_pad), lambda i: (0, 0, 0)),
                pl.BlockSpec((L_pad, hidden_pad), lambda i: (0, 0)),
                pl.BlockSpec((HW_pad, hidden_pad), lambda i: (0, 0)),
                pl.BlockSpec((1, HW_pad), lambda i: (0, 0)),
                pl.BlockSpec((C_pad, HW_pad), lambda i: (0, 0)),
            ],
            out_specs=[
                pl.BlockSpec((L_pad, HW_pad), lambda i: (0, 0)),
                pl.BlockSpec((L_pad, C_pad), lambda i: (0, 0)),
                pl.BlockSpec((L_pad, HW_pad), lambda i: (0, 0)),
            ],
        ),
        compiler_params=pltpu.CompilerParams(
            dimension_semantics=("arbitrary",)),
    )(partials, emb_label, params["w_dec"], params["b_dec"], conv_mat)

    att = att[:L, :HW].reshape(L, H, W)
    attended = attended[:L, :C]
    densified = densified[:L, :HW].reshape(L, H, W)
    return att, attended, densified


# --------------------------------------------------------------------------
# Pure-JAX f32 reference (mirrors the PyTorch forward exactly)
# --------------------------------------------------------------------------
def _reference(conv_feat, pos_cls, label_weights, w_enc, w_dec, b_dec,
               do_softmax=True):
    _, C, H, W = conv_feat.shape
    L = pos_cls.shape[0]
    conv_flat = conv_feat.reshape(1, -1)
    emb_label = label_weights[pos_cls]
    emb_feat = conv_flat @ w_enc.T
    att = (emb_label * emb_feat) @ w_dec.T + b_dec
    if do_softmax:
        att = jax.nn.softmax(att, axis=1)
    conv_mat = conv_feat.reshape(C, H * W)
    attended = att @ conv_mat.T
    densified = attended @ conv_mat
    return att.reshape(L, H, W), attended, densified.reshape(L, H, W)


if __name__ == "__main__":
    # Small, module-consistent shapes.
    num_class = 8
    C, H, W = 4, 16, 16          # input_feat_channel=4, input_feat_size=16
    hidden = 32                  # hidden_feat_dim
    L = 6                        # number of positive classes

    key = jax.random.PRNGKey(0)
    k1, k2, k3, k4 = jax.random.split(key, 4)

    label_weights = jax.random.normal(k1, (num_class, hidden), jnp.float32) * 0.01
    w_enc = jax.random.normal(k2, (hidden, C * H * W), jnp.float32) * 0.01
    w_dec = jax.random.normal(k3, (H * W, hidden), jnp.float32) * 0.01
    b_dec = jnp.zeros((H * W,), jnp.float32)

    conv_feat = jax.random.normal(k4, (1, C, H, W), jnp.float32)
    pos_cls = jnp.array([0, 3, 1, 5, 2, 7], dtype=jnp.int32)

    # (do_softmax, k_tile): k_tile=256 forces a multi-step CHW reduction per
    # split so the pipelined accumulator path is exercised at these toy shapes;
    # k_tile=None exercises the default (large-slab) path.
    for do_softmax, kt in ((True, 256), (False, 256), (True, None)):
        params = prepare_attention_global_params(
            label_weights, w_enc, w_dec, b_dec, (C, H, W),
            num_splits=2, k_tile=kt)

        outs = attention_layer_global(params, conv_feat, pos_cls,
                                      do_softmax=do_softmax)
        outs = jax.block_until_ready(outs)

        refs = _reference(conv_feat, pos_cls, label_weights, w_enc, w_dec,
                          b_dec, do_softmax=do_softmax)
        for o, r in zip(outs, refs):
            assert o.shape == r.shape, (o.shape, r.shape)
            # only the streamed w_enc (and conv_flat) are bf16 -> tight-ish tol
            assert jnp.allclose(o, r, rtol=5e-2, atol=5e-3), "mismatch vs reference"

    print("KERNEL_OK")
</pallas_src>

<mosaic_0001>
module attributes {stable_mosaic.version = 11 : i64} {
  func.func @_encode_stream_kernel(%arg0: i32, %arg1: i32, %arg2: memref<1x1024xbf16, #tpu.memory_space<vmem>>, %arg3: memref<256x128xbf16, #tpu.memory_space<vmem>>, %arg4: memref<1x8x128xf32, #tpu.memory_space<vmem>>, %arg5: memref<1x128xf32, #tpu.memory_space<vmem>>) attributes {dimension_semantics = [#tpu.dimension_semantics<parallel>, #tpu.dimension_semantics<arbitrary>], iteration_bounds = array<i64: 2, 2>, scalar_prefetch = 0 : i64, scratch_operands = 1 : i64, tpu.core_type = #tpu.core_type<tc>, window_params = [{pipeline_mode = #tpu.pipeline_mode<synchronous>, transform_indices = @transform_0, window_bounds = array<i64: 1, 1024>}, {transform_indices = @transform_1, window_bounds = array<i64: 256, 128>}, {transform_indices = @transform_2, window_bounds = array<i64: 1, 8, 128>}]} {
    %c0_i32 = arith.constant 0 : i32
    %0 = arith.cmpi eq, %arg1, %c0_i32 : i32
    %1 = arith.extui %0 : i1 to i32
    %c0_i32_0 = arith.constant 0 : i32
    %2 = arith.cmpi ne, %1, %c0_i32_0 : i32
    scf.if %2 {
      %cst_8 = arith.constant 0.000000e+00 : f32
      %17 = vector.broadcast %cst_8 : f32 to vector<1x128xf32>
      %c0_9 = arith.constant 0 : index
      %c0_10 = arith.constant 0 : index
      %18 = vector.load %arg5[%c0_9, %c0_10] : memref<1x128xf32, #tpu.memory_space<vmem>>, vector<1x128xf32>
      tpu.vector_store %arg5[%c0_9, %c0_10], %17 {strides = array<i32>} : memref<1x128xf32, #tpu.memory_space<vmem>>, vector<1x128xf32>,
    } else {
    }
    %c2_i32 = arith.constant 2 : i32
    %3 = arith.muli %arg0, %c2_i32 : i32
    %4 = arith.addi %3, %arg1 : i32
    %c256_i32 = arith.constant 256 : i32
    %5 = arith.muli %4, %c256_i32 : i32
    %6 = tpu.assume_multiple %5, 256 : i32
    %c0 = arith.constant 0 : index
    %7 = arith.index_cast %6 : i32 to index
    %8 = vector.load %arg2[%c0, %7] : memref<1x1024xbf16, #tpu.memory_space<vmem>>, vector<1x256xbf16>
    %c0_1 = arith.constant 0 : index
    %c0_2 = arith.constant 0 : index
    %9 = vector.load %arg5[%c0_1, %c0_2] : memref<1x128xf32, #tpu.memory_space<vmem>>, vector<1x128xf32>
    %c0_3 = arith.constant 0 : index
    %c0_4 = arith.constant 0 : index
    %10 = vector.load %arg3[%c0_3, %c0_4] : memref<256x128xbf16, #tpu.memory_space<vmem>>, vector<256x128xbf16>
    %cst = arith.constant dense<0.000000e+00> : vector<1x128xf32>
    %11 = tpu.matmul %8, %10, %cst {dimension_numbers = #tpu.dot_dimension_numbers<[1], [0], [0], [1], [0, 0, 1, 1], [], []>} : vector<1x256xbf16>, vector<256x128xbf16>, vector<1x128xf32> -> vector<1x128xf32>
    %12 = arith.addf %9, %11 : vector<1x128xf32>
    %c0_5 = arith.constant 0 : index
    %c0_6 = arith.constant 0 : index
    %13 = vector.load %arg5[%c0_5, %c0_6] : memref<1x128xf32, #tpu.memory_space<vmem>>, vector<1x128xf32>
    tpu.vector_store %arg5[%c0_5, %c0_6], %12 {strides = array<i32>} : memref<1x128xf32, #tpu.memory_space<vmem>>, vector<1x128xf32>,
    %c1_i32 = arith.constant 1 : i32
    %14 = arith.cmpi eq, %arg1, %c1_i32 : i32
    %15 = arith.extui %14 : i1 to i32
    %c0_i32_7 = arith.constant 0 : i32
    %16 = arith.cmpi ne, %15, %c0_i32_7 : i32
    scf.if %16 {
      %c0_8 = arith.constant 0 : index
      %c0_9 = arith.constant 0 : index
      %17 = vector.load %arg5[%c0_8, %c0_9] : memref<1x128xf32, #tpu.memory_space<vmem>>, vector<1x128xf32>
      %18 = vector.shape_cast %17 : vector<1x128xf32> to vector<1x1x128xf32>
      %19 = vector.shape_cast %18 : vector<1x1x128xf32> to vector<1x1x128xf32>
      %20 = vector.broadcast %19 : vector<1x1x128xf32> to vector<1x8x128xf32>
      %c0_10 = arith.constant 0 : index
      %c0_11 = arith.constant 0 : index
      %c0_12 = arith.constant 0 : index
      %21 = vector.load %arg4[%c0_10, %c0_11, %c0_12] : memref<1x8x128xf32, #tpu.memory_space<vmem>>, vector<1x8x128xf32>
      tpu.vector_store %arg4[%c0_10, %c0_11, %c0_12], %20 {strides = array<i32>} : memref<1x8x128xf32, #tpu.memory_space<vmem>>, vector<1x8x128xf32>,
    } else {
    }
    return
  }
  func.func @transform_0(%arg0: i32, %arg1: i32) -> (i32, i32) {
    %c0_i32 = arith.constant 0 : i32
    %c0_i32_0 = arith.constant 0 : i32
    %c0_i32_1 = arith.constant 0 : i32
    return %c0_i32, %c0_i32_0 : i32, i32
  }
  func.func @transform_1(%arg0: i32, %arg1: i32) -> (i32, i32) {
    %c2_i32 = arith.constant 2 : i32
    %0 = arith.muli %arg0, %c2_i32 : i32
    %1 = arith.addi %0, %arg1 : i32
    %c0_i32 = arith.constant 0 : i32
    %c0_i32_0 = arith.constant 0 : i32
    return %1, %c0_i32 : i32, i32
  }
  func.func @transform_2(%arg0: i32, %arg1: i32) -> (i32, i32, i32) {
    %c0_i32 = arith.constant 0 : i32
    %c0_i32_0 = arith.constant 0 : i32
    %c0_i32_1 = arith.constant 0 : i32
    return %arg0, %c0_i32, %c0_i32_0 : i32, i32, i32
  }
}

</mosaic_0001>

<bundles_post_ra>
// kernel: tpu_custom_call.1
= control target key start
LH: loop header
LB: loop body
LE: loop exit
PB: predicated region body
PF: predicated region fallthrough
CT: control target
= control target key end

     0   :  { %s1171_s0 = inlined_call_operand.hbm [shape: bf16[1,1024], index: 0, kind: input, shape index: {}]   ;;  %s1172_s1 = inlined_call_operand.hbm [shape: bf16[1024,128], index: 1, kind: input, shape index: {}]   ;;  %s1173_s2 = inlined_call_operand.hbm [shape: f32[2,8,128], index: 2, kind: output, shape index: {}]  }
   0x1   :  { %1181 = sst [smem:[#allocation16_spill]] %s1171_s0 }
   0x2   :  { %1182 = sst [smem:[#allocation17_spill]] %s1172_s1 }
   0x3   :  { %7 = vsyncpa [#allocation4], 0 }
   0x4   :  { %8 = vsyncpa [#allocation7], 0 }
   0x5   :  { %10 = vsyncpa [#allocation7 + $0x1], 0 }
   0x6   :  { %11 = vsyncpa [#allocation5], 0 }
   0x7   :  { %13 = vsyncpa [#allocation5 + $0x1], 0  ;;  %s926_s9 = smov 0   ;;  %s928_s10 = smov 0  }
   0x8   :  { %s930_s11 = smov 0   ;;  %s932_s12 = smov 0  }
   0x9   :  { %s934_s13 = smov 0   ;;  %s936_s14 = smov 0  }
   0xa   :  { %s938_s15 = smov 0   ;;  %s940_s16 = smov 0  }
   0xb   :  { %s942_s17 = smov 0   ;;  %s944_s18 = smov 0  }
   0xc   :  { %s946_s19 = smov 0  }
   0xd LB: > { %1183 = sst [smem:[#allocation12_spill]] %s862_s9  ;;  %s527_s20 = sadd.s32 4294967295, %s902_s19   ;;  %s902_s19 = sphi %s946_s19, %s19_s19   ;;  %s898_s18 = sphi %s944_s18, %s1214_s18   ;;  %s894_s17 = sphi %s942_s17, %s1213_s17   ;;  %s890_s16 = sphi %s940_s16, %s1212_s16   ;;  %s886_s15 = sphi %s938_s15, %s1204_s15   ;;  %s882_s14 = sphi %s936_s14, %s1211_s14   ;;  %s878_s13 = sphi %s934_s13, %s1210_s13   ;;  %s874_s12 = sphi %s932_s12, %s1209_s12   ;;  %s870_s11 = sphi %s930_s11, %s1208_s11   ;;  %s866_s10 = sphi %s928_s10, %s1207_s10   ;;  %s862_s9 = sphi %s926_s9, %s1206_s9  }
   0xe   : > { %1184 = sst [smem:[#allocation13_spill]] %s894_s17  ;;  %s528_s21 = sadd.s32 4294967294, %s902_s19  }
   0xf   : > { %p70_p0 = scmp.ne.s32.totalorder %s882_s14, %s878_s13  ;;  %p71_p1 = scmp.eq.s32.totalorder %s902_s19, 0 }
  0x10   : > { %p76_p2 = scmp.ne.s32.totalorder %s878_s13, %s874_s12  ;;  %p986_p3 = scmp.eq.s32.totalorder %s527_s20, 0 }
  0x11   : > { %p991_p4 = por %p71_p1, %p70_p0  ;;  %p99_p5 = scmp.ne.s32.totalorder %s870_s11, %s866_s10 }
  0x12   : > { %p999_p6 = por %p986_p3, %p76_p2  ;;  %p100_p7 = scmp.eq.s32.totalorder %s527_s20, 3 }
  0x13   : > { %p105_p8 = scmp.ne.s32.totalorder %s866_s10, %s862_s9  ;;  %p106_p9 = scmp.eq.s32.totalorder %s528_s21, 3 }
  0x14   : > { %s1187_s26 = scalar_select %p999_p6, 1, 0 }
  0x15   : > { %p1005_p10 = por %p100_p7, %p99_p5  ;;  %p531_p11 = scmp.ge.s32.totalorder %s902_s19, 1 }
  0x16   : > { %p1010_p12 = por %p106_p9, %p105_p8  ;;  %p113_p13 = scmp.lt.s32.totalorder %s902_s19, 5 }
  0x17   : > { %s1188_s27 = scalar_select %p1005_p10, 1, 0 }
  0x18   : > { %s1189_s28 = scalar_select %p1010_p12, 1, 0 }
  0x19   : > { %p1015_p0 = pnand %p531_p11, %p113_p13  ;;  %s904_s30 = smov [#allocation3]  }
  0x1a   : > { %1190 = sst [smem:[#allocation14_spill]] %s1189_s28  ;;  %s126_s3 = sshll.u32 %s904_s30, 4  ;;  %s127_s3 = int_to_ptr.vmem [resolvable:$true] %s126_s3 }
  0x1b   : > { %s1191_s29 = scalar_select %p1015_p0, 1, 0 }
  0x1c   : > { %p599_p1 = pneg %p1015_p0  ;;  %p612_p2 = scmp.lt.s32.totalorder %s902_s19, 4 }
  0x1d   : > { %s735_s5 = scalar_lea.vmem %s127_s3, 128  ;;  %p743_p12 = scmp.lt.s32.totalorder %s127_s3, %s127_s3 }
  0x1e   : > { %p600_p5 = pnand %p599_p1, %p986_p3  ;;  %p1026_p7 = pnand %p612_p2, %p991_p4 }
  0x1f   : > { %p736_p9 = scmp.ne.s32.totalorder %s127_s3, %s735_s5  ;;  %p744_p10 = scmp.lt.s32.totalorder %s735_s5, %s735_s5 }
  0x20   : > { %p726_p8 = pneg %p600_p5 }
  0x21   : > { %p745_p6 = por %p744_p10, %p743_p12 }
  0x22   : > { %p738_p11 = pnand %p736_p9, %p726_p8 }
  0x24   : > { %p739_p13 = pneg %p738_p11 }
  0x26   : > { %p746_p0 = pnand %p745_p6, %p739_p13 }
  0x28   : > { %749 = shalt.err (!%p746_p0)
}
  0x29   : > { %s1193_s0 = sld [smem:[#allocation16_spill]]  ;;  %s28_s8 = sadd.s32 1, %s894_s17 }
  0x2a   : > { %s31_s12 = sadd.s32 1, %s898_s18  ;;  %p29_p4 = scmp.ge.s32.totalorder %s28_s8, 2 }
  0x2b   : > { %s529_s20 = sshll.u32 %s898_s18, 1  ;;  %s137_s25 = sand.u32 1, %s882_s14  }
  0x2c   : > { %s57_s21 = sadd.s32 %s894_s17, %s529_s20  ;;  %s1216_s8 = smov (%p29_p4, %s28_s8), 0 }
  0x2d   : > { %s1218_s12 = smov (!%p29_p4, %s31_s12), %s898_s18  ;;  %s534_s30 = sshll.u32 %s137_s25, 7 }
  0x2e   : > { %p33_p6 = scmp.ge.s32.totalorder %s1218_s12, 2  ;;  %s568_s5 = sshll.u32 %s57_s21, 11 }
  0x2f   : > { %602 = dma.hbm_to_vmem [thread:$0]  (!%p600_p5), %s1193_s0, 128, %s127_s3, [#allocation4]  }
  0x30   : > { %s141_s3 = scalar_lea.vmem [#allocation6], %s534_s30  ;;  %s1220_s12 = smov (%p33_p6, %s1218_s12), 0 }
  0x31   : > { %s150_s6 = sshll.u32 %s141_s3, 4  ;;  %1194 = sst [smem:[#allocation15_spill]] %s1220_s12  ;;  %s1048_s6 = int_to_ptr.vmem [resolvable:$true] %s150_s6 }
  0x32   : > { %s1195_s1 = sld [smem:[#allocation17_spill]]  ;;  %s530_s24 = sshll.u32 %s1220_s12, 1 }
  0x33   : > { %s86_s0 = ssub.s32 %s898_s18, %s1220_s12  ;;  %s59_s17 = sadd.s32 %s530_s24, %s1216_s8 }
  0x34   : > { %p87_p10 = scmp.eq.s32.totalorder %s86_s0, 0  ;;  %s60_s30 = ssub.s32 %s57_s21, %s59_s17 }
  0x35   : > { %p61_p12 = scmp.eq.s32.totalorder %s60_s30, 0  ;;  %s1196_s3 = sadd.s32 1, %s870_s11 }
  0x36   : > { %s1057_s28 = scalar_select %p87_p10, %s870_s11, %s1196_s3  }
  0x37   : > { %s1197_s9 = sadd.s32 1, %s882_s14  ;;  %s138_s7 = scalar_lea.sflag [#allocation7], %s137_s25 }
  0x38   : > { %s1046_s20 = scalar_lea.hbm %s1195_s1, %s568_s5  ;;  %p752_p0 = pneg %p1026_p7 }
  0x39   : > { %s1062_s22 = scalar_select %p61_p12, %s882_s14, %s1197_s9  }
  0x3a   : > { %s763_s5 = scalar_lea.vmem %s1048_s6, 2048  ;;  %s905_s1 = smov [#allocation6]  }
  0x3b   : > { %p764_p1 = scmp.ne.s32.totalorder %s1048_s6, %s763_s5  ;;  %s768_s12 = sshll.u32 %s905_s1, 4  ;;  %s769_s12 = int_to_ptr.vmem [resolvable:$false] %s768_s12 }
  0x3c   : > { %s770_s24 = scalar_lea.vmem %s769_s12, 4096  ;;  %p771_p8 = scmp.lt.s32.totalorder %s1048_s6, %s769_s12 }
  0x3d   : > { %p766_p2 = pnand %p764_p1, %p752_p0  ;;  %p772_p9 = scmp.lt.s32.totalorder %s770_s24, %s763_s5 }
  0x3f   : > { %p767_p5 = pneg %p766_p2  ;;  %p773_p11 = por %p772_p9, %p771_p8 }
  0x41   : > { %p774_p13 = pnand %p773_p11, %p767_p5 }
  0x43   : > { %777 = shalt.err (!%p774_p13)
}
  0x44   : > { %s906_s0 = smov 64   ;;  %s907_s9 = smov 4  }
  0x45   : > { %606 = dma.hbm_to_vmem [thread:$0]  (!%p1026_p7), %s1046_s20, 2048, %s1048_s6, %s138_s7, %s906_s0, %s906_s0, %s907_s9  }
  0x46   : > { %p1198_p4 = scmp.ne.s32.totalorder %s1191_s29, 0 }
  0x48   : > { %162 = sbr.rel (%p1198_p4) target bundleno = 356 (0x164), region = 28 }
  0x4d   : > { %849 = dma.done.wait (%p986_p3), [#allocation4], 128  }
  0x4e   : > { %851 = vsyncadd (%p986_p3), [#allocation4], 4294967168  ;;  %s168_s1 = sand.u32 1, %s878_s13   ;;  %p1199_p6 = scmp.ne.s32.totalorder %s1187_s26, 0 }
  0x4f   : > { %s540_s17 = sshll.u32 %s168_s1, 7  ;;  %s169_s12 = scalar_lea.sflag [#allocation7], %s168_s1 }
  0x50   : > { %s1080_s21 = scalar_lea.vmem [#allocation6], %s540_s17 }
  0x51   : > { %853 = dma.done.wait (%p1199_p6), %s169_s12, 2048  }
  0x52   : > { %855 = vsyncadd (%p1199_p6), %s169_s12, 4294965248  ;;  %s190_s29 = sand.u32 1, %s866_s10   ;;  %p542_p3 = scmp.ne.s32.totalorder %s886_s15, 0 }
  0x53   : > { %s1089_s4 = sshll.u32 %s190_s29, 3 }
  0x54   : > { %s192_s23 = scalar_lea.vmem [#allocation8], %s1089_s4  ;;  %200 = sbr.rel (%p542_p3) target bundleno = 91 (0x5b), region = 40 }
  0x59   : > { %v908_v0 = vmov 0.0  }
  0x5a   : > { %201 = vst [vmem:[#allocation2] sm:$0x1] %v908_v0 }
  0x5b PF: > { %v708_v1 = vld [vmem:[%s1080_s21 + $0x78] sm:$0xff]   ;;  %s543_s26 = sshll.u32 %s890_s16, 1  ;;  %v710_v3 = vld [vmem:[%s1080_s21 + $0x70] sm:$0xff]   ;;  %v712_v5 = vld [vmem:[%s1080_s21 + $0x68] sm:$0xff]   ;;  %v254_v10 = vlaneseq  ;;  %v909_v14 = vmov 1966171168  }
  0x5c   : > { %v709_v2 = vld [vmem:[%s1080_s21 + $0x38] sm:$0xff]   ;;  %569 = vmatprep.subr.bf16.mxu0 %v708_v1  ;;  %v711_v4 = vld [vmem:[%s1080_s21 + $0x30] sm:$0xff]   ;;  %s203_s25 = sadd.s32 %s886_s15, %s543_s26  ;;  %v713_v6 = vld [vmem:[%s1080_s21 + $0x28] sm:$0xff]   ;;  %v252_v15 = vunpack.c.l.s4 %v909_v14  ;;  %p562_p7 = scmp.ne.s32.totalorder %s886_s15, 1 }
  0x5d   : > { %570 = vmatpush3.bf16.msra.mxu0 %v709_v2  ;;  %s544_s6 = sshll.u32 %s203_s25, 8  ;;  %v714_v7 = vld [vmem:[%s1080_s21 + $0x60] sm:$0xff]   ;;  %v716_v9 = vld [vmem:[%s1080_s21 + $0x58] sm:$0xff]   ;;  %v718_v12 = vld [vmem:[%s1080_s21 + $0x50] sm:$0xff]   ;;  %v255_v16 = vshrl.u32 %v254_v10, 7 }
  0x5e   : > { %571 = vmatprep.subr.bf16.mxu0 %v710_v3  ;;  %s205_s20 = sshra.s32 %s544_s6, 7  ;;  %v715_v8 = vld [vmem:[%s1080_s21 + $0x20] sm:$0xff]   ;;  %v717_v11 = vld [vmem:[%s1080_s21 + $0x18] sm:$0xff]   ;;  %v719_v17 = vld [vmem:[%s1080_s21 + $0x10] sm:$0xff]   ;;  %v253_v19 = vunpack.c.0.s8 %v252_v15 }
  0x5f   : > { %s207_s30 = scalar_lea.vmem [#allocation3], %s205_s20  ;;  %v720_v20 = vld [vmem:[%s1080_s21 + $0x48] sm:$0xff]   ;;  %v722_v24 = vld [vmem:[%s1080_s21 + $0x40] sm:$0xff]  }
  0x60   : > { %v545_v13 = vld.sshfl [vmem:[%s207_s30] sm:$0x11 pattern:$0x75316420]  ;;  %v256_v21 = vsub.s32 %v253_v19, %v255_v16  ;;  %v721_v22 = vld [vmem:[%s1080_s21 + $0x8] sm:$0xff]   ;;  %v723_v25 = vld [vmem:[%s1080_s21] sm:$0xff]  }
  0x61   : > { %572 = vmatpush3.bf16.msra.mxu0 %v711_v4  ;;  %v250_v18 = vcombine.high %v545_v13, %v545_v13  ;;  %v209_v28 = vld [vmem:[#allocation2] sm:$0x1] }
  0x62   : > { %573 = vmatprep.subr.bf16.mxu0 %v712_v5  ;;  %v257_v26 = vrot.slane %v545_v13, %v256_v21 }
  0x63   : > { %v264_v23 = vrot.slane %v250_v18, %v256_v21 }
  0x65   : > { %574 = vmatpush3.bf16.msra.mxu0 %v713_v6  ;;  %395 = vmatprep.mubr.bf16.mxu0 %v264_v23 }
  0x66   : > { %575 = vmatprep.subr.bf16.mxu0 %v714_v7 }
  0x69   : > { %576 = vmatpush3.bf16.msra.mxu0 %v715_v8 }
  0x6a   : > { %577 = vmatprep.subr.bf16.mxu0 %v716_v9 }
  0x6d   : > { %578 = vmatpush3.bf16.msra.mxu0 %v717_v11 }
  0x6e   : > { %579 = vmatprep.subr.bf16.mxu0 %v718_v12 }
  0x71   : > { %580 = vmatpush3.bf16.msra.mxu0 %v719_v17 }
  0x72   : > { %581 = vmatprep.subr.bf16.mxu0 %v720_v20 }
  0x75   : > { %582 = vmatpush3.bf16.msra.mxu0 %v721_v22 }
  0x76   : > { %583 = vmatprep.subr.bf16.mxu0 %v722_v24 }
  0x79   : > { %584 = vmatpush3.bf16.msra.mxu0 %v723_v25 }
  0x7c   : > { %396 = vmatmul.mubr.bf16.vlgmr.msra.gmra.mxu0 %v257_v26 }
 0x13c   : > { %v585_v27 = vpop.f32.mrf.mxu0 }
 0x13e   : > { %v586_v29 = vpop.f32.mrf.mxu0 }
 0x13f   : > { %v587_v30 = vadd.f32 %v586_v29, %v585_v27  ;;  %408 = sbr.rel (%p562_p7) target bundleno = 332 (0x14c), region = 44 }
 0x140   : > { %v588_v31 = vpop.f32.mrf.mxu0 }
 0x141   : > { %v403_v32 = vadd.f32 %v587_v30, %v209_v28 }
 0x142   : > { %v589_v33 = vpop.f32.mrf.mxu0 }
 0x143   : > { %404 = vst [vmem:[#allocation2] sm:$0x1] %v403_v32 }
 0x14a   : > { %v563_v34 = vld [vmem:[#allocation2] ss:$0 sm:$0xff] }
 0x14b   : > { %416 = vst [vmem:[%s192_s23] sm:$0xff] %v563_v34 }
 0x14c PF: > { %s565_s3 = sshll.u32 %s890_s16, 7  ;;  %s431_s0 = sshll.u32 %s192_s23, 4  ;;  %s432_s0 = int_to_ptr.vmem [resolvable:$true] %s431_s0 }
 0x14d   : > { %s429_s24 = scalar_lea.hbm %s1173_s2, %s565_s3  ;;  %s418_s15 = scalar_lea.sflag [#allocation5], %s190_s29 }
 0x14e   : > { %s778_s9 = scalar_lea.vmem %s432_s0, 128  ;;  %p1200_p12 = scmp.ne.s32.totalorder %s1188_s27, 0 }
 0x14f   : > { %p779_p10 = scmp.ne.s32.totalorder %s432_s0, %s778_s9  ;;  %s910_s1 = smov [#allocation8]  }
 0x150   : > { %s782_s17 = sshll.u32 %s910_s1, 4  ;;  %s783_s17 = int_to_ptr.vmem [resolvable:$false] %s782_s17 }
 0x151   : > { %p780_p0 = pnand %p779_p10, %p1200_p12  ;;  %s784_s12 = scalar_lea.vmem %s783_s17, 256 }
 0x152   : > { %p785_p2 = scmp.lt.s32.totalorder %s432_s0, %s783_s17  ;;  %p786_p5 = scmp.lt.s32.totalorder %s784_s12, %s778_s9 }
 0x153   : > { %p781_p1 = pneg %p780_p0 }
 0x154   : > { %p787_p8 = por %p786_p5, %p785_p2 }
 0x156   : > { %p788_p9 = pnand %p787_p8, %p781_p1 }
 0x158   : > { %791 = shalt.err (!%p788_p9)
}
 0x159   : > { %s792_s16 = scalar_lea.hbm %s429_s24, 128  ;;  %s796_s4 = scalar_lea.hbm %s1173_s2, 256 }
 0x15a   : > { %p793_p11 = scmp.ne.s32.totalorder %s429_s24, %s792_s16  ;;  %p797_p6 = scmp.lt.s32.totalorder %s429_s24, %s1173_s2 }
 0x15b   : > { %p798_p3 = scmp.lt.s32.totalorder %s796_s4, %s792_s16 }
 0x15c   : > { %p794_p13 = pnand %p793_p11, %p1200_p12 }
 0x15d   : > { %p799_p7 = por %p798_p3, %p797_p6 }
 0x15e   : > { %p795_p4 = pneg %p794_p13 }
 0x160   : > { %p800_p10 = pnand %p799_p7, %p795_p4 }
 0x162   : > { %803 = shalt.err (!%p800_p10)
}
 0x163   : > { %597 = dma.vmem_to_hbm [thread:$0]  (%p1200_p12), %s432_s0, 128, %s429_s24, %s418_s15  }
 0x164 PF: > { %s1201_s25 = sld [smem:[#allocation12_spill]]  ;;  %p614_p0 = scmp.ge.s32.totalorder %s902_s19, 2 }
 0x165   : > { %s1202_s6 = sld [smem:[#allocation14_spill]] }
 0x16a   : > { %s443_s20 = sand.u32 1, %s1201_s25  }
 0x16b   : > { %p1203_p1 = scmp.ne.s32.totalorder %s1202_s6, 0  ;;  %s444_s30 = scalar_lea.sflag [#allocation5], %s443_s20 }
 0x16d   : > { %p608_p2 = pnand %p614_p0, %p1203_p1 }
 0x16f   : > { %p609_p5 = pneg %p608_p2 }
 0x171   : > { %857 = dma.done.wait (%p609_p5), %s444_s30, 128  }
 0x172   : > { %859 = vsyncadd (%p609_p5), %s444_s30, 4294967168  ;;  %s19_s19 = sadd.s32 1, %s902_s19   ;;  %s1204_s15 = sld [smem:[#allocation13_spill]] }
 0x173   : > { %p16_p8 = scmp.ge.s32.totalorder %s19_s19, 6   ;;  %s1205_s27 = sld [smem:[#allocation15_spill]] }
 0x174   : > { %s1206_s9 = smov %s866_s10  ;;  %s1207_s10 = smov %s870_s11 }
 0x175   : > { %s1208_s11 = smov %s1057_s28  ;;  %s1209_s12 = smov %s878_s13 }
 0x176   : > { %s1210_s13 = smov %s882_s14  ;;  %s1211_s14 = smov %s1062_s22 }
 0x177   : > { %s1212_s16 = smov %s898_s18  ;;  %s1213_s17 = smov %s1216_s8 }
 0x178   :  { %18 = sbr.rel (!%p16_p8) target bundleno = 13 (0xd), region = 87 }
 0x179   : > { %s1214_s18 = smov %s1205_s27 }
 0x17d   :  { %449 = vsyncpa [#allocation4], 1 }
 0x17e   :  { %451 = vsyncpa [#allocation4 + $0x1], 1 }
 0x17f   :  { %452 = vsyncpa [#allocation7], 1 }
 0x180   :  { %454 = vsyncpa [#allocation7 + $0x1], 1 }
 0x181   :  { %455 = vsyncpa [#allocation5], 1 }
 0x182   :  { %457 = vsyncpa [#allocation5 + $0x1], 1 }

</bundles_post_ra>
